<compile_context>
chip_gen: v5e
topology: v5e:2x2
jax: 0.10.0
libtpu: 0.0.40
codegen_flags: <defaults>
</compile_context>

<pallas_src>
import jax
import jax.numpy as jnp
from jax.experimental import pallas as pl
from jax.experimental.pallas import tpu as pltpu

IN_F, H1, H2, OUT_F = 34, 496, 128, 24
# Lane-padded (multiple-of-128) feature sizes used inside the kernel.
IN_P, H1_P, H2_P, OUT_P = 128, 512, 128, 128
BM_MAX = 512  # batch rows per grid step


def _round_up(n, m):
    return ((n + m - 1) // m) * m


def flag_mlp_kernel(x_ref, w1_ref, b1_ref, w2_ref, b2_ref, w3_ref, b3_ref, o_ref):
    # x:  (BM, 128)   w1: (128, 512)  b1: (1, 512)
    # h1: (BM, 512)   w2: (512, 128)  b2: (1, 128)
    # h2: (BM, 128)   w3: (128, 128)  b3: (1, 128)
    x = x_ref[...]
    h1 = jnp.dot(x, w1_ref[...], preferred_element_type=jnp.float32) + b1_ref[...]
    h2 = jnp.dot(h1, w2_ref[...], preferred_element_type=jnp.float32) + b2_ref[...]
    y = jnp.dot(h2, w3_ref[...], preferred_element_type=jnp.float32) + b3_ref[...]
    o_ref[...] = y.astype(o_ref.dtype)


def prepare_params(params):
    """One-time prep: transpose PyTorch (out,in) weights to (in,out) and
    zero-pad ragged feature dims to multiples of 128.  Call once, reuse."""
    w1 = jnp.zeros((IN_P, H1_P), jnp.float32).at[:IN_F, :H1].set(params["W1"].T)
    b1 = jnp.zeros((1, H1_P), jnp.float32).at[0, :H1].set(params["b1"])
    w2 = jnp.zeros((H1_P, H2_P), jnp.float32).at[:H1, :H2].set(params["W2"].T)
    b2 = jnp.zeros((1, H2_P), jnp.float32).at[0, :H2].set(params["b2"])
    w3 = jnp.zeros((H2_P, OUT_P), jnp.float32).at[:H2, :OUT_F].set(params["W3"].T)
    b3 = jnp.zeros((1, OUT_P), jnp.float32).at[0, :OUT_F].set(params["b3"])
    return (w1, b1, w2, b2, w3, b3)


@jax.jit
def flag_model_forward(x, prepped):
    """x: (B, 34) float32.  prepped: output of prepare_params (pre-transposed,
    pre-padded).  Returns (B, 24) float32."""
    w1, b1, w2, b2, w3, b3 = prepped
    B = x.shape[0]

    # Batch tile: full (padded, >=8) batch when small, BM_MAX when large.
    bm = BM_MAX if B >= BM_MAX else _round_up(max(B, 8), 8)
    b_pad = _round_up(B, bm)

    # Zero-pad batch rows and input features to the kernel layout.
    x_p = jnp.zeros((b_pad, IN_P), jnp.float32).at[:B, :IN_F].set(x)

    grid = (b_pad // bm,)
    flops = 2 * b_pad * (IN_P * H1_P + H1_P * H2_P + H2_P * OUT_P)
    bytes_accessed = 4 * (
        b_pad * IN_P + b_pad * OUT_P
        + IN_P * H1_P + H1_P
        + H1_P * H2_P + H2_P
        + H2_P * OUT_P + OUT_P
    )

    def const_spec(shape):
        # Weight/bias blocks: whole array, same block index every grid step
        # -> stays resident in VMEM across the batch loop (no re-DMA).
        return pl.BlockSpec(shape, lambda i: (0, 0))

    out_p = pl.pallas_call(
        flag_mlp_kernel,
        out_shape=jax.ShapeDtypeStruct((b_pad, OUT_P), jnp.float32),
        grid=grid,
        in_specs=[
            pl.BlockSpec((bm, IN_P), lambda i: (i, 0)),   # x tile
            const_spec((IN_P, H1_P)), const_spec((1, H1_P)),
            const_spec((H1_P, H2_P)), const_spec((1, H2_P)),
            const_spec((H2_P, OUT_P)), const_spec((1, OUT_P)),
        ],
        out_specs=pl.BlockSpec((bm, OUT_P), lambda i: (i, 0)),
        compiler_params=pltpu.CompilerParams(
            dimension_semantics=("parallel",),
        ),
        cost_estimate=pl.CostEstimate(
            flops=flops, bytes_accessed=bytes_accessed, transcendentals=0,
        ),
    )(x_p, w1, b1, w2, b2, w3, b3)

    return out_p[:B, :OUT_F]


def init_params(key):
    """Deterministic init mimicking PyTorch Linear default U(-1/sqrt(in), 1/sqrt(in))."""
    ks = jax.random.split(key, 6)

    def lin(kw, kb, fan_in, fan_out):
        bound = 1.0 / jnp.sqrt(jnp.float32(fan_in))
        W = jax.random.uniform(kw, (fan_out, fan_in), jnp.float32, -bound, bound)
        b = jax.random.uniform(kb, (fan_out,), jnp.float32, -bound, bound)
        return W, b

    W1, b1 = lin(ks[0], ks[1], IN_F, H1)
    W2, b2 = lin(ks[2], ks[3], H1, H2)
    W3, b3 = lin(ks[4], ks[5], H2, OUT_F)
    return {"W1": W1, "b1": b1, "W2": W2, "b2": b2, "W3": W3, "b3": b3}


def reference_forward(x, p):
    h1 = x @ p["W1"].T + p["b1"]
    h2 = h1 @ p["W2"].T + p["b2"]
    return h2 @ p["W3"].T + p["b3"]


if __name__ == "__main__":
    key = jax.random.PRNGKey(0)
    k_param, k_x = jax.random.split(key)
    params = init_params(k_param)
    prepped = prepare_params(params)  # one-time: transpose + pad

    B = 8
    x = jax.random.normal(k_x, (B, IN_F), jnp.float32)

    y = flag_model_forward(x, prepped)
    y = jax.block_until_ready(y)

    y_ref = reference_forward(x, params)
    assert y.shape == (B, OUT_F)
    assert jnp.allclose(y, y_ref, atol=1e-4, rtol=1e-4)
    print("KERNEL_OK")
</pallas_src>

<mosaic_0001>
module attributes {stable_mosaic.version = 11 : i64} {
  func.func @flag_mlp_kernel(%arg0: i32, %arg1: memref<8x128xf32, #tpu.memory_space<vmem>>, %arg2: memref<128x512xf32, #tpu.memory_space<vmem>>, %arg3: memref<1x512xf32, #tpu.memory_space<vmem>>, %arg4: memref<512x128xf32, #tpu.memory_space<vmem>>, %arg5: memref<1x128xf32, #tpu.memory_space<vmem>>, %arg6: memref<128x128xf32, #tpu.memory_space<vmem>>, %arg7: memref<1x128xf32, #tpu.memory_space<vmem>>, %arg8: memref<8x128xf32, #tpu.memory_space<vmem>>) attributes {dimension_semantics = [#tpu.dimension_semantics<parallel>], iteration_bounds = array<i64: 1>, scalar_prefetch = 0 : i64, scratch_operands = 0 : i64, tpu.core_type = #tpu.core_type<tc>, window_params = [{transform_indices = @transform_0, window_bounds = array<i64: 8, 128>}, {pipeline_mode = #tpu.pipeline_mode<synchronous>, transform_indices = @transform_1, window_bounds = array<i64: 128, 512>}, {pipeline_mode = #tpu.pipeline_mode<synchronous>, transform_indices = @transform_2, window_bounds = array<i64: 1, 512>}, {pipeline_mode = #tpu.pipeline_mode<synchronous>, transform_indices = @transform_3, window_bounds = array<i64: 512, 128>}, {pipeline_mode = #tpu.pipeline_mode<synchronous>, transform_indices = @transform_4, window_bounds = array<i64: 1, 128>}, {pipeline_mode = #tpu.pipeline_mode<synchronous>, transform_indices = @transform_5, window_bounds = array<i64: 128, 128>}, {pipeline_mode = #tpu.pipeline_mode<synchronous>, transform_indices = @transform_6, window_bounds = array<i64: 1, 128>}, {transform_indices = @transform_7, window_bounds = array<i64: 8, 128>}]} {
    %c0 = arith.constant 0 : index
    %c0_0 = arith.constant 0 : index
    %0 = vector.load %arg1[%c0, %c0_0] : memref<8x128xf32, #tpu.memory_space<vmem>>, vector<8x128xf32>
    %c0_1 = arith.constant 0 : index
    %c0_2 = arith.constant 0 : index
    %1 = vector.load %arg2[%c0_1, %c0_2] : memref<128x512xf32, #tpu.memory_space<vmem>>, vector<128x512xf32>
    %cst = arith.constant dense<0.000000e+00> : vector<8x512xf32>
    %2 = tpu.matmul %0, %1, %cst {dimension_numbers = #tpu.dot_dimension_numbers<[1], [0], [0], [1], [0, 0, 1, 1], [], []>} : vector<8x128xf32>, vector<128x512xf32>, vector<8x512xf32> -> vector<8x512xf32>
    %c0_3 = arith.constant 0 : index
    %c0_4 = arith.constant 0 : index
    %3 = vector.load %arg3[%c0_3, %c0_4] : memref<1x512xf32, #tpu.memory_space<vmem>>, vector<1x512xf32>
    %4 = vector.broadcast %3 : vector<1x512xf32> to vector<8x512xf32>
    %5 = arith.addf %2, %4 : vector<8x512xf32>
    %c0_5 = arith.constant 0 : index
    %c0_6 = arith.constant 0 : index
    %6 = vector.load %arg4[%c0_5, %c0_6] : memref<512x128xf32, #tpu.memory_space<vmem>>, vector<512x128xf32>
    %cst_7 = arith.constant dense<0.000000e+00> : vector<8x128xf32>
    %7 = tpu.matmul %5, %6, %cst_7 {dimension_numbers = #tpu.dot_dimension_numbers<[1], [0], [0], [1], [0, 0, 1, 1], [], []>} : vector<8x512xf32>, vector<512x128xf32>, vector<8x128xf32> -> vector<8x128xf32>
    %c0_8 = arith.constant 0 : index
    %c0_9 = arith.constant 0 : index
    %8 = vector.load %arg5[%c0_8, %c0_9] : memref<1x128xf32, #tpu.memory_space<vmem>>, vector<1x128xf32>
    %9 = vector.broadcast %8 : vector<1x128xf32> to vector<8x128xf32>
    %10 = arith.addf %7, %9 : vector<8x128xf32>
    %c0_10 = arith.constant 0 : index
    %c0_11 = arith.constant 0 : index
    %11 = vector.load %arg6[%c0_10, %c0_11] : memref<128x128xf32, #tpu.memory_space<vmem>>, vector<128x128xf32>
    %cst_12 = arith.constant dense<0.000000e+00> : vector<8x128xf32>
    %12 = tpu.matmul %10, %11, %cst_12 {dimension_numbers = #tpu.dot_dimension_numbers<[1], [0], [0], [1], [0, 0, 1, 1], [], []>} : vector<8x128xf32>, vector<128x128xf32>, vector<8x128xf32> -> vector<8x128xf32>
    %c0_13 = arith.constant 0 : index
    %c0_14 = arith.constant 0 : index
    %13 = vector.load %arg7[%c0_13, %c0_14] : memref<1x128xf32, #tpu.memory_space<vmem>>, vector<1x128xf32>
    %14 = vector.broadcast %13 : vector<1x128xf32> to vector<8x128xf32>
    %15 = arith.addf %12, %14 : vector<8x128xf32>
    %c0_15 = arith.constant 0 : index
    %c0_16 = arith.constant 0 : index
    %16 = vector.load %arg8[%c0_15, %c0_16] : memref<8x128xf32, #tpu.memory_space<vmem>>, vector<8x128xf32>
    tpu.vector_store %arg8[%c0_15, %c0_16], %15 {strides = array<i32>} : memref<8x128xf32, #tpu.memory_space<vmem>>, vector<8x128xf32>,
    return
  }
  func.func @transform_0(%arg0: i32) -> (i32, i32) {
    %c0_i32 = arith.constant 0 : i32
    %c0_i32_0 = arith.constant 0 : i32
    return %arg0, %c0_i32 : i32, i32
  }
  func.func @transform_1(%arg0: i32) -> (i32, i32) {
    %c0_i32 = arith.constant 0 : i32
    %c0_i32_0 = arith.constant 0 : i32
    %c0_i32_1 = arith.constant 0 : i32
    return %c0_i32, %c0_i32_0 : i32, i32
  }
  func.func @transform_2(%arg0: i32) -> (i32, i32) {
    %c0_i32 = arith.constant 0 : i32
    %c0_i32_0 = arith.constant 0 : i32
    %c0_i32_1 = arith.constant 0 : i32
    return %c0_i32, %c0_i32_0 : i32, i32
  }
  func.func @transform_3(%arg0: i32) -> (i32, i32) {
    %c0_i32 = arith.constant 0 : i32
    %c0_i32_0 = arith.constant 0 : i32
    %c0_i32_1 = arith.constant 0 : i32
    return %c0_i32, %c0_i32_0 : i32, i32
  }
  func.func @transform_4(%arg0: i32) -> (i32, i32) {
    %c0_i32 = arith.constant 0 : i32
    %c0_i32_0 = arith.constant 0 : i32
    %c0_i32_1 = arith.constant 0 : i32
    return %c0_i32, %c0_i32_0 : i32, i32
  }
  func.func @transform_5(%arg0: i32) -> (i32, i32) {
    %c0_i32 = arith.constant 0 : i32
    %c0_i32_0 = arith.constant 0 : i32
    %c0_i32_1 = arith.constant 0 : i32
    return %c0_i32, %c0_i32_0 : i32, i32
  }
  func.func @transform_6(%arg0: i32) -> (i32, i32) {
    %c0_i32 = arith.constant 0 : i32
    %c0_i32_0 = arith.constant 0 : i32
    %c0_i32_1 = arith.constant 0 : i32
    return %c0_i32, %c0_i32_0 : i32, i32
  }
  func.func @transform_7(%arg0: i32) -> (i32, i32) {
    %c0_i32 = arith.constant 0 : i32
    %c0_i32_0 = arith.constant 0 : i32
    return %arg0, %c0_i32 : i32, i32
  }
}

</mosaic_0001>

<bundles_post_ra>
// kernel: flag_model_forward.1
= control target key start
LH: loop header
LB: loop body
LE: loop exit
PB: predicated region body
PF: predicated region fallthrough
CT: control target
= control target key end

     0   :  { %12 = vsyncpa [#allocation3], 0  ;;  %s620_s0 = inlined_call_operand.vmem [shape: f32[8,128], index: 0, kind: input, shape index: {}]   ;;  %s621_s1 = inlined_call_operand.hbm [shape: f32[128,512], index: 1, kind: input, shape index: {}]   ;;  %s622_s2 = inlined_call_operand.vmem [shape: f32[1,512], index: 2, kind: input, shape index: {}]   ;;  %s623_s3 = inlined_call_operand.hbm [shape: f32[512,128], index: 3, kind: input, shape index: {}]   ;;  %s624_s4 = inlined_call_operand.vmem [shape: f32[1,128], index: 4, kind: input, shape index: {}]   ;;  %s625_s5 = inlined_call_operand.hbm [shape: f32[128,128], index: 5, kind: input, shape index: {}]   ;;  %s626_s6 = inlined_call_operand.vmem [shape: f32[1,128], index: 6, kind: input, shape index: {}]   ;;  %s627_s7 = inlined_call_operand.hbm [shape: f32[8,128], index: 7, kind: output, shape index: {}]  }
   0x1   :  { %13 = vsyncpa [#allocation6], 0  ;;  %s36_s26 = sshll.u32 %s623_s3, 4  ;;  %s37_s26 = int_to_ptr.hbm [resolvable:$true] %s36_s26 }
   0x2   :  { %14 = vsyncpa [#allocation4], 0  ;;  %s548_s27 = smov [#allocation5]   ;;  %s21_s8 = sshll.u32 %s621_s1, 4  ;;  %s22_s8 = int_to_ptr.hbm [resolvable:$true] %s21_s8 }
   0x3   :  { %s38_s28 = sshll.u32 %s548_s27, 4  ;;  %s549_s9 = smov 128   ;;  %s39_s28 = int_to_ptr.vmem [resolvable:$true] %s38_s28 }
   0x4   :  { %s550_s10 = smov 8   ;;  %s551_s11 = smov [#allocation2]  }
   0x5   :  { %44 = dma.hbm_to_vmem [thread:$0]  %s37_s26, 8192, %s39_s28, [#allocation6], %s549_s9, %s549_s9, %s550_s10  }
   0x6   :  { %s23_s12 = sshll.u32 %s551_s11, 4  ;;  %s552_s13 = smov 512   ;;  %s24_s12 = int_to_ptr.vmem [resolvable:$true] %s23_s12 }
   0x7   :  { %s553_s14 = smov 32   ;;  %s51_s16 = sshll.u32 %s625_s5, 4  ;;  %s52_s16 = int_to_ptr.hbm [resolvable:$true] %s51_s16 }
   0x8   :  { %29 = dma.hbm_to_vmem [thread:$0]  %s22_s8, 8192, %s24_s12, [#allocation3], %s552_s13, %s552_s13, %s553_s14  }
   0x9   :  { %s554_s17 = smov [#allocation7]  }
   0xa   :  { %s53_s18 = sshll.u32 %s554_s17, 4  ;;  %s54_s18 = int_to_ptr.vmem [resolvable:$true] %s53_s18 }
   0xb   :  { %59 = dma.hbm_to_vmem [thread:$0]  %s52_s16, 2048, %s54_s18, [#allocation6], %s549_s9, %s549_s9, %s550_s10  }
   0xc   :  { %542 = dma.done.wait [#allocation3], 8192  }
   0xd   :  { %543 = vsyncadd [#allocation3], 4294959104 }
   0xe   :  { %544 = dma.done.wait [#allocation6], 10240  }
   0xf   :  { %545 = vsyncadd [#allocation6], 4294957056  ;;  %v137_v0 = vld [vmem:[#allocation2 + $0x1f0] sm:$0xff]  ;;  %v138_v2 = vld [vmem:[#allocation2 + $0x1f8] sm:$0xff]  ;;  %s555_s23 = smov [#allocation8]   ;;  %s425_s27 = sshll.u32 %s627_s7, 4  ;;  %s426_s27 = int_to_ptr.hbm [resolvable:$true] %s425_s27 }
  0x10   :  { %v133_v1 = vld [vmem:[#allocation2 + $0x1d0] sm:$0xff]  ;;  %189 = vmatpush.msra.mxu2 %v137_v0  ;;  %209 = vmatpush.msra.mxu3 %v138_v2  ;;  %v134_v3 = vld [vmem:[#allocation2 + $0x1d8] sm:$0xff]  ;;  %v135_v6 = vld [vmem:[#allocation2 + $0x1e0] sm:$0xff]  ;;  %s423_s24 = sshll.u32 %s555_s23, 4  ;;  %s424_s24 = int_to_ptr.vmem [resolvable:$true] %s423_s24 }
  0x11   :  { %v129_v4 = vld [vmem:[#allocation2 + $0x1b0] sm:$0xff]  ;;  %v130_v5 = vld [vmem:[#allocation2 + $0x1b8] sm:$0xff]  ;;  %v131_v7 = vld [vmem:[#allocation2 + $0x1c0] sm:$0xff]  ;;  %149 = vmatpush.msra.mxu0 %v135_v6 }
  0x12   :  { %190 = vmatpush.msra.mxu2 %v133_v1  ;;  %210 = vmatpush.msra.mxu3 %v134_v3  ;;  %v136_v8 = vld [vmem:[#allocation2 + $0x1e8] sm:$0xff]  ;;  %v125_v9 = vld [vmem:[#allocation2 + $0x190] sm:$0xff]  ;;  %v126_v10 = vld [vmem:[#allocation2 + $0x198] sm:$0xff] }
  0x13   :  { %169 = vmatpush.msra.mxu1 %v136_v8  ;;  %v127_v11 = vld [vmem:[#allocation2 + $0x1a0] sm:$0xff]  ;;  %v132_v12 = vld [vmem:[#allocation2 + $0x1c8] sm:$0xff]  ;;  %v121_v13 = vld [vmem:[#allocation2 + $0x170] sm:$0xff]  ;;  %150 = vmatpush.msra.mxu0 %v131_v7 }
  0x14   :  { %191 = vmatpush.msra.mxu2 %v129_v4  ;;  %211 = vmatpush.msra.mxu3 %v130_v5  ;;  %v122_v14 = vld [vmem:[#allocation2 + $0x178] sm:$0xff]  ;;  %v128_v15 = vld [vmem:[#allocation2 + $0x1a8] sm:$0xff]  ;;  %v123_v16 = vld [vmem:[#allocation2 + $0x180] sm:$0xff] }
  0x15   :  { %170 = vmatpush.msra.mxu1 %v132_v12  ;;  %v124_v17 = vld [vmem:[#allocation2 + $0x188] sm:$0xff]  ;;  %v117_v18 = vld [vmem:[#allocation2 + $0x150] sm:$0xff]  ;;  %151 = vmatpush.msra.mxu0 %v127_v11  ;;  %v118_v19 = vld [vmem:[#allocation2 + $0x158] sm:$0xff] }
  0x16   :  { %192 = vmatpush.msra.mxu2 %v125_v9  ;;  %212 = vmatpush.msra.mxu3 %v126_v10  ;;  %v119_v20 = vld [vmem:[#allocation2 + $0x160] sm:$0xff]  ;;  %v120_v21 = vld [vmem:[#allocation2 + $0x168] sm:$0xff]  ;;  %v113_v22 = vld [vmem:[#allocation2 + $0x130] sm:$0xff] }
  0x17   :  { %171 = vmatpush.msra.mxu1 %v128_v15  ;;  %152 = vmatpush.msra.mxu0 %v123_v16  ;;  %v114_v23 = vld [vmem:[#allocation2 + $0x138] sm:$0xff]  ;;  %v115_v24 = vld [vmem:[#allocation2 + $0x140] sm:$0xff]  ;;  %v116_v25 = vld [vmem:[#allocation2 + $0x148] sm:$0xff] }
  0x18   :  { %193 = vmatpush.msra.mxu2 %v121_v13  ;;  %213 = vmatpush.msra.mxu3 %v122_v14  ;;  %v109_v26 = vld [vmem:[#allocation2 + $0x110] sm:$0xff]  ;;  %v110_v27 = vld [vmem:[#allocation2 + $0x118] sm:$0xff]  ;;  %v111_v28 = vld [vmem:[#allocation2 + $0x120] sm:$0xff] }
  0x19   :  { %172 = vmatpush.msra.mxu1 %v124_v17  ;;  %153 = vmatpush.msra.mxu0 %v119_v20  ;;  %v112_v29 = vld [vmem:[#allocation2 + $0x128] sm:$0xff]  ;;  %v105_v30 = vld [vmem:[#allocation2 + $0xf0] sm:$0xff]  ;;  %v106_v31 = vld [vmem:[#allocation2 + $0xf8] sm:$0xff] }
  0x1a   :  { %194 = vmatpush.msra.mxu2 %v117_v18  ;;  %214 = vmatpush.msra.mxu3 %v118_v19  ;;  %v107_v32 = vld [vmem:[#allocation2 + $0x100] sm:$0xff]  ;;  %v108_v33 = vld [vmem:[#allocation2 + $0x108] sm:$0xff]  ;;  %v101_v34 = vld [vmem:[#allocation2 + $0xd0] sm:$0xff] }
  0x1b   :  { %173 = vmatpush.msra.mxu1 %v120_v21  ;;  %154 = vmatpush.msra.mxu0 %v115_v24  ;;  %v102_v35 = vld [vmem:[#allocation2 + $0xd8] sm:$0xff]  ;;  %v103_v36 = vld [vmem:[#allocation2 + $0xe0] sm:$0xff]  ;;  %v104_v37 = vld [vmem:[#allocation2 + $0xe8] sm:$0xff] }
  0x1c   :  { %195 = vmatpush.msra.mxu2 %v113_v22  ;;  %215 = vmatpush.msra.mxu3 %v114_v23  ;;  %v97_v38 = vld [vmem:[#allocation2 + $0xb0] sm:$0xff]  ;;  %v98_v39 = vld [vmem:[#allocation2 + $0xb8] sm:$0xff]  ;;  %v99_v40 = vld [vmem:[#allocation2 + $0xc0] sm:$0xff] }
  0x1d   :  { %174 = vmatpush.msra.mxu1 %v116_v25  ;;  %155 = vmatpush.msra.mxu0 %v111_v28  ;;  %v100_v41 = vld [vmem:[#allocation2 + $0xc8] sm:$0xff]  ;;  %v93_v42 = vld [vmem:[#allocation2 + $0x90] sm:$0xff]  ;;  %v94_v43 = vld [vmem:[#allocation2 + $0x98] sm:$0xff] }
  0x1e   :  { %196 = vmatpush.msra.mxu2 %v109_v26  ;;  %216 = vmatpush.msra.mxu3 %v110_v27  ;;  %v95_v44 = vld [vmem:[#allocation2 + $0xa0] sm:$0xff]  ;;  %v96_v45 = vld [vmem:[#allocation2 + $0xa8] sm:$0xff]  ;;  %v89_v46 = vld [vmem:[#allocation2 + $0x70] sm:$0xff] }
  0x1f   :  { %175 = vmatpush.msra.mxu1 %v112_v29  ;;  %156 = vmatpush.msra.mxu0 %v107_v32  ;;  %v90_v47 = vld [vmem:[#allocation2 + $0x78] sm:$0xff]  ;;  %v91_v48 = vld [vmem:[#allocation2 + $0x80] sm:$0xff]  ;;  %v92_v49 = vld [vmem:[#allocation2 + $0x88] sm:$0xff] }
  0x20   :  { %197 = vmatpush.msra.mxu2 %v105_v30  ;;  %217 = vmatpush.msra.mxu3 %v106_v31  ;;  %v85_v50 = vld [vmem:[#allocation2 + $0x50] sm:$0xff]  ;;  %v86_v51 = vld [vmem:[#allocation2 + $0x58] sm:$0xff]  ;;  %v87_v52 = vld [vmem:[#allocation2 + $0x60] sm:$0xff] }
  0x21   :  { %176 = vmatpush.msra.mxu1 %v108_v33  ;;  %157 = vmatpush.msra.mxu0 %v103_v36  ;;  %v88_v53 = vld [vmem:[#allocation2 + $0x68] sm:$0xff]  ;;  %v81_v54 = vld [vmem:[#allocation2 + $0x30] sm:$0xff]  ;;  %v82_v55 = vld [vmem:[#allocation2 + $0x38] sm:$0xff] }
  0x22   :  { %198 = vmatpush.msra.mxu2 %v101_v34  ;;  %218 = vmatpush.msra.mxu3 %v102_v35  ;;  %v83_v56 = vld [vmem:[#allocation2 + $0x40] sm:$0xff]  ;;  %v84_v57 = vld [vmem:[#allocation2 + $0x48] sm:$0xff]  ;;  %v77_v58 = vld [vmem:[#allocation2 + $0x10] sm:$0xff] }
  0x23   :  { %177 = vmatpush.msra.mxu1 %v104_v37  ;;  %158 = vmatpush.msra.mxu0 %v99_v40  ;;  %v78_v59 = vld [vmem:[#allocation2 + $0x18] sm:$0xff]  ;;  %v74_v60 = vld [vmem:[%s620_s0] sm:$0xff]  ;;  %v80_v62 = vld [vmem:[#allocation2 + $0x28] sm:$0xff] }
  0x24   :  { %199 = vmatpush.msra.mxu2 %v97_v38  ;;  %219 = vmatpush.msra.mxu3 %v98_v39  ;;  %v79_v61 = vld [vmem:[#allocation2 + $0x20] sm:$0xff]  ;;  %v276_v63 = vld [vmem:[#allocation5 + $0x178] sm:$0xff]  ;;  %v76_v2 = vld [vmem:[#allocation2 + $0x8] sm:$0xff] }
  0x25   :  { %178 = vmatpush.msra.mxu1 %v100_v41  ;;  %159 = vmatpush.msra.mxu0 %v95_v44  ;;  %v292_v0 = vld [vmem:[#allocation5 + $0x1f8] sm:$0xff]  ;;  %v75_v1 = vld [vmem:[#allocation2] sm:$0xff]  ;;  %v275_v4 = vld [vmem:[#allocation5 + $0x170] sm:$0xff] }
  0x26   :  { %200 = vmatpush.msra.mxu2 %v93_v42  ;;  %220 = vmatpush.msra.mxu3 %v94_v43  ;;  %v244_v3 = vld [vmem:[#allocation5 + $0x78] sm:$0xff]  ;;  %v291_v6 = vld [vmem:[#allocation5 + $0x1f0] sm:$0xff]  ;;  %v274_v8 = vld [vmem:[#allocation5 + $0x168] sm:$0xff] }
  0x27   :  { %179 = vmatpush.msra.mxu1 %v96_v45  ;;  %160 = vmatpush.msra.mxu0 %v91_v48  ;;  %v260_v5 = vld [vmem:[#allocation5 + $0xf8] sm:$0xff]  ;;  %v243_v7 = vld [vmem:[#allocation5 + $0x70] sm:$0xff]  ;;  %v290_v10 = vld [vmem:[#allocation5 + $0x1e8] sm:$0xff] }
  0x28   :  { %201 = vmatpush.msra.mxu2 %v89_v46  ;;  %221 = vmatpush.msra.mxu3 %v90_v47  ;;  %v259_v9 = vld [vmem:[#allocation5 + $0xf0] sm:$0xff]  ;;  %v242_v11 = vld [vmem:[#allocation5 + $0x68] sm:$0xff]  ;;  %v273_v12 = vld [vmem:[#allocation5 + $0x160] sm:$0xff] }
  0x29   :  { %180 = vmatpush.msra.mxu1 %v92_v49  ;;  %161 = vmatpush.msra.mxu0 %v87_v52  ;;  %v258_v13 = vld [vmem:[#allocation5 + $0xe8] sm:$0xff]  ;;  %v289_v14 = vld [vmem:[#allocation5 + $0x1e0] sm:$0xff]  ;;  %v272_v16 = vld [vmem:[#allocation5 + $0x158] sm:$0xff] }
  0x2a   :  { %202 = vmatpush.msra.mxu2 %v85_v50  ;;  %222 = vmatpush.msra.mxu3 %v86_v51  ;;  %v241_v15 = vld [vmem:[#allocation5 + $0x60] sm:$0xff]  ;;  %v288_v18 = vld [vmem:[#allocation5 + $0x1d8] sm:$0xff]  ;;  %v271_v20 = vld [vmem:[#allocation5 + $0x150] sm:$0xff] }
  0x2b   :  { %181 = vmatpush.msra.mxu1 %v88_v53  ;;  %162 = vmatpush.msra.mxu0 %v83_v56  ;;  %v257_v17 = vld [vmem:[#allocation5 + $0xe0] sm:$0xff]  ;;  %v240_v19 = vld [vmem:[#allocation5 + $0x58] sm:$0xff]  ;;  %v287_v22 = vld [vmem:[#allocation5 + $0x1d0] sm:$0xff] }
  0x2c   :  { %203 = vmatpush.msra.mxu2 %v81_v54  ;;  %223 = vmatpush.msra.mxu3 %v82_v55  ;;  %v256_v21 = vld [vmem:[#allocation5 + $0xd8] sm:$0xff]  ;;  %v239_v23 = vld [vmem:[#allocation5 + $0x50] sm:$0xff]  ;;  %v270_v24 = vld [vmem:[#allocation5 + $0x148] sm:$0xff] }
  0x2d   :  { %182 = vmatpush.msra.mxu1 %v84_v57  ;;  %163 = vmatpush.msra.mxu0 %v79_v61  ;;  %v255_v25 = vld [vmem:[#allocation5 + $0xd0] sm:$0xff]  ;;  %v286_v26 = vld [vmem:[#allocation5 + $0x1c8] sm:$0xff]  ;;  %v269_v28 = vld [vmem:[#allocation5 + $0x140] sm:$0xff] }
  0x2e   :  { %204 = vmatpush.msra.mxu2 %v77_v58  ;;  %224 = vmatpush.msra.mxu3 %v78_v59  ;;  %v238_v27 = vld [vmem:[#allocation5 + $0x48] sm:$0xff]  ;;  %v285_v30 = vld [vmem:[#allocation5 + $0x1c0] sm:$0xff]  ;;  %v268_v32 = vld [vmem:[#allocation5 + $0x138] sm:$0xff] }
  0x2f   :  { %205 = vmatmul.f32.vlgmr.msra.gmra.mxu2 %v74_v60  ;;  %225 = vmatmul.f32.vlgmr.msra.gmra.mxu3 %v74_v60  ;;  %v254_v29 = vld [vmem:[#allocation5 + $0xc8] sm:$0xff]  ;;  %v237_v31 = vld [vmem:[#allocation5 + $0x40] sm:$0xff]  ;;  %v284_v34 = vld [vmem:[#allocation5 + $0x1b8] sm:$0xff] }
  0x30   :  { %183 = vmatpush.msra.mxu1 %v80_v62  ;;  %337 = vmatpush.msrb.mxu2 %v276_v63  ;;  %v253_v33 = vld [vmem:[#allocation5 + $0xc0] sm:$0xff]  ;;  %v236_v35 = vld [vmem:[#allocation5 + $0x38] sm:$0xff]  ;;  %v267_v36 = vld [vmem:[#allocation5 + $0x130] sm:$0xff] }
  0x31   :  { %357 = vmatpush.msrb.mxu3 %v292_v0  ;;  %164 = vmatpush.msra.mxu0 %v75_v1  ;;  %v252_v37 = vld [vmem:[#allocation5 + $0xb8] sm:$0xff]  ;;  %v283_v38 = vld [vmem:[#allocation5 + $0x1b0] sm:$0xff]  ;;  %v266_v40 = vld [vmem:[#allocation5 + $0x128] sm:$0xff] }
  0x32   :  { %184 = vmatpush.msra.mxu1 %v76_v2  ;;  %165 = vmatmul.f32.vlgmr.msra.gmra.mxu0 %v74_v60  ;;  %v235_v39 = vld [vmem:[#allocation5 + $0x30] sm:$0xff]  ;;  %v282_v42 = vld [vmem:[#allocation5 + $0x1a8] sm:$0xff]  ;;  %v265_v44 = vld [vmem:[#allocation5 + $0x120] sm:$0xff] }
  0x33   :  { %185 = vmatmul.f32.vlgmr.msra.gmra.mxu1 %v74_v60  ;;  %297 = vmatpush.msrb.mxu0 %v244_v3  ;;  %v251_v41 = vld [vmem:[#allocation5 + $0xb0] sm:$0xff]  ;;  %v234_v43 = vld [vmem:[#allocation5 + $0x28] sm:$0xff]  ;;  %v281_v46 = vld [vmem:[#allocation5 + $0x1a0] sm:$0xff] }
  0x34   :  { %338 = vmatpush.msrb.mxu2 %v275_v4  ;;  %317 = vmatpush.msrb.mxu1 %v260_v5  ;;  %v250_v45 = vld [vmem:[#allocation5 + $0xa8] sm:$0xff]  ;;  %v233_v47 = vld [vmem:[#allocation5 + $0x20] sm:$0xff]  ;;  %v264_v48 = vld [vmem:[#allocation5 + $0x118] sm:$0xff] }
  0x35   :  { %358 = vmatpush.msrb.mxu3 %v291_v6  ;;  %298 = vmatpush.msrb.mxu0 %v243_v7  ;;  %v249_v49 = vld [vmem:[#allocation5 + $0xa0] sm:$0xff]  ;;  %v280_v50 = vld [vmem:[#allocation5 + $0x198] sm:$0xff]  ;;  %v263_v52 = vld [vmem:[#allocation5 + $0x110] sm:$0xff] }
  0x36   :  { %339 = vmatpush.msrb.mxu2 %v274_v8  ;;  %318 = vmatpush.msrb.mxu1 %v259_v9  ;;  %v232_v51 = vld [vmem:[#allocation5 + $0x18] sm:$0xff]  ;;  %v231_v53 = vld [vmem:[#allocation5 + $0x10] sm:$0xff]  ;;  %v262_v55 = vld [vmem:[#allocation5 + $0x108] sm:$0xff] }
  0x37   :  { %359 = vmatpush.msrb.mxu3 %v290_v10  ;;  %299 = vmatpush.msrb.mxu0 %v242_v11  ;;  %v248_v54 = vld [vmem:[#allocation5 + $0x98] sm:$0xff]  ;;  %v279_v56 = vld [vmem:[#allocation5 + $0x190] sm:$0xff]  ;;  %v230_v57 = vld [vmem:[#allocation5 + $0x8] sm:$0xff] }
  0x38   :  { %340 = vmatpush.msrb.mxu2 %v273_v12  ;;  %319 = vmatpush.msrb.mxu1 %v258_v13  ;;  %v247_v58 = vld [vmem:[#allocation5 + $0x90] sm:$0xff]  ;;  %v261_v59 = vld [vmem:[#allocation5 + $0x100] sm:$0xff]  ;;  %v278_v60 = vld [vmem:[#allocation5 + $0x188] sm:$0xff] }
  0x39   :  { %360 = vmatpush.msrb.mxu3 %v289_v14  ;;  %300 = vmatpush.msrb.mxu0 %v241_v15  ;;  %v229_v61 = vld [vmem:[#allocation5] sm:$0xff]  ;;  %v246_v62 = vld [vmem:[#allocation5 + $0x88] sm:$0xff]  ;;  %v392_v1 = vld [vmem:[#allocation7 + $0x78] sm:$0xff] }
  0x3a   :  { %341 = vmatpush.msrb.mxu2 %v272_v16  ;;  %320 = vmatpush.msrb.mxu1 %v257_v17  ;;  %v277_v63 = vld [vmem:[#allocation5 + $0x180] sm:$0xff]  ;;  %v391_v2 = vld [vmem:[#allocation7 + $0x70] sm:$0xff]  ;;  %v390_v3 = vld [vmem:[#allocation7 + $0x68] sm:$0xff] }
  0x3b   :  { %361 = vmatpush.msrb.mxu3 %v288_v18  ;;  %301 = vmatpush.msrb.mxu0 %v240_v19  ;;  %v245_v0 = vld [vmem:[#allocation5 + $0x80] sm:$0xff]  ;;  %v388_v5 = vld [vmem:[#allocation7 + $0x58] sm:$0xff]  ;;  %v387_v6 = vld [vmem:[#allocation7 + $0x50] sm:$0xff] }
  0x3c   :  { %342 = vmatpush.msrb.mxu2 %v271_v20  ;;  %321 = vmatpush.msrb.mxu1 %v256_v21  ;;  %v389_v4 = vld [vmem:[#allocation7 + $0x60] sm:$0xff]  ;;  %v386_v7 = vld [vmem:[#allocation7 + $0x48] sm:$0xff]  ;;  %v384_v9 = vld [vmem:[#allocation7 + $0x38] sm:$0xff] }
  0x3d   :  { %362 = vmatpush.msrb.mxu3 %v287_v22  ;;  %302 = vmatpush.msrb.mxu0 %v239_v23  ;;  %v385_v8 = vld [vmem:[#allocation7 + $0x40] sm:$0xff]  ;;  %v383_v10 = vld [vmem:[#allocation7 + $0x30] sm:$0xff]  ;;  %v382_v11 = vld [vmem:[#allocation7 + $0x28] sm:$0xff] }
  0x3e   :  { %343 = vmatpush.msrb.mxu2 %v270_v24  ;;  %322 = vmatpush.msrb.mxu1 %v255_v25  ;;  %v139_v12 = vld [vmem:[%s622_s2] sm:$0xf] }
  0x3f   :  { %363 = vmatpush.msrb.mxu3 %v286_v26  ;;  %303 = vmatpush.msrb.mxu0 %v238_v27  ;;  %v141_v13 = vperm.slane %v139_v12, 0  ;;  %v142_v14 = vperm.slane %v139_v12, 1  ;;  %v143_v15 = vperm.slane %v139_v12, 2  ;;  %v144_v16 = vperm.slane %v139_v12, 3  ;;  %v381_v25 = vld [vmem:[#allocation7 + $0x20] sm:$0xff]  ;;  %v380_v26 = vld [vmem:[#allocation7 + $0x18] sm:$0xff] }
  0x40   :  { %344 = vmatpush.msrb.mxu2 %v269_v28  ;;  %323 = vmatpush.msrb.mxu1 %v254_v29  ;;  %v379_v27 = vld [vmem:[#allocation7 + $0x10] sm:$0xff]  ;;  %v378_v28 = vld [vmem:[#allocation7 + $0x8] sm:$0xff]  ;;  %v377_v29 = vld [vmem:[#allocation7] sm:$0xff] }
  0x41   :  { %364 = vmatpush.msrb.mxu3 %v285_v30  ;;  %304 = vmatpush.msrb.mxu0 %v237_v31  ;;  %v444_v30 = vld [vmem:[%s624_s4] ss:$0 sm:$0xff] }
  0x42   :  { %345 = vmatpush.msrb.mxu2 %v268_v32  ;;  %324 = vmatpush.msrb.mxu1 %v253_v33 }
  0x43   :  { %365 = vmatpush.msrb.mxu3 %v284_v34  ;;  %305 = vmatpush.msrb.mxu0 %v236_v35 }
  0x44   :  { %346 = vmatpush.msrb.mxu2 %v267_v36  ;;  %325 = vmatpush.msrb.mxu1 %v252_v37 }
  0x45   :  { %366 = vmatpush.msrb.mxu3 %v283_v38  ;;  %306 = vmatpush.msrb.mxu0 %v235_v39  ;;  %v445_v39 = vld [vmem:[%s626_s6] ss:$0 sm:$0xff] }
  0x46   :  { %347 = vmatpush.msrb.mxu2 %v266_v40  ;;  %326 = vmatpush.msrb.mxu1 %v251_v41 }
  0x47   :  { %367 = vmatpush.msrb.mxu3 %v282_v42  ;;  %307 = vmatpush.msrb.mxu0 %v234_v43 }
  0x48   :  { %348 = vmatpush.msrb.mxu2 %v265_v44  ;;  %327 = vmatpush.msrb.mxu1 %v250_v45 }
  0x49   :  { %368 = vmatpush.msrb.mxu3 %v281_v46  ;;  %308 = vmatpush.msrb.mxu0 %v233_v47 }
  0x4a   :  { %349 = vmatpush.msrb.mxu2 %v264_v48  ;;  %328 = vmatpush.msrb.mxu1 %v249_v49 }
  0x4b   :  { %369 = vmatpush.msrb.mxu3 %v280_v50  ;;  %309 = vmatpush.msrb.mxu0 %v232_v51 }
  0x4c   :  { %350 = vmatpush.msrb.mxu2 %v263_v52  ;;  %329 = vmatpush.msrb.mxu1 %v248_v54 }
  0x4d   :  { %310 = vmatpush.msrb.mxu0 %v231_v53  ;;  %370 = vmatpush.msrb.mxu3 %v279_v56 }
  0x4e   :  { %351 = vmatpush.msrb.mxu2 %v262_v55  ;;  %330 = vmatpush.msrb.mxu1 %v247_v58 }
  0x4f   :  { %311 = vmatpush.msrb.mxu0 %v230_v57  ;;  %371 = vmatpush.msrb.mxu3 %v278_v60 }
  0x50   :  { %352 = vmatpush.msrb.mxu2 %v261_v59  ;;  %331 = vmatpush.msrb.mxu1 %v246_v62 }
  0x51   :  { %312 = vmatpush.msrb.mxu0 %v229_v61  ;;  %372 = vmatpush.msrb.mxu3 %v277_v63 }
  0x52   :  { %332 = vmatpush.msrb.mxu1 %v245_v0 }
  0x53   :  { %397 = vmatpush.msra.mxu0 %v392_v1 }
  0x55   :  { %398 = vmatpush.msra.mxu0 %v391_v2 }
  0x57   :  { %399 = vmatpush.msra.mxu0 %v390_v3 }
  0x59   :  { %400 = vmatpush.msra.mxu0 %v389_v4 }
  0x5b   :  { %401 = vmatpush.msra.mxu0 %v388_v5 }
  0x5d   :  { %402 = vmatpush.msra.mxu0 %v387_v6 }
  0x5f   :  { %403 = vmatpush.msra.mxu0 %v386_v7 }
  0x61   :  { %404 = vmatpush.msra.mxu0 %v385_v8 }
  0x63   :  { %405 = vmatpush.msra.mxu0 %v384_v9 }
  0x65   :  { %406 = vmatpush.msra.mxu0 %v383_v10 }
  0x67   :  { %407 = vmatpush.msra.mxu0 %v382_v11 }
  0x69   :  { %408 = vmatpush.msra.mxu0 %v381_v25 }
  0x6b   :  { %409 = vmatpush.msra.mxu0 %v380_v26 }
  0x6d   :  { %410 = vmatpush.msra.mxu0 %v379_v27 }
  0x6f   :  { %411 = vmatpush.msra.mxu0 %v378_v28 }
  0x71   :  { %412 = vmatpush.msra.mxu0 %v377_v29 }
  0xaf   :  { %v166_v17 = vpop.f32.mrf.mxu0 }
  0xb0   :  { %v186_v18 = vpop.f32.mrf.mxu1  ;;  %v167_v19 = vadd.f32 %v166_v17, %v141_v13 }
  0xb1   :  { %v187_v20 = vadd.f32 %v186_v18, %v142_v14 }
  0xb2   :  { %v206_v21 = vpop.f32.mrf.mxu2  ;;  %v226_v22 = vpop.f32.mrf.mxu3  ;;  %313 = vmatmul.f32.vlgmr.msrb.gmra.mxu0 %v167_v19 }
  0xb3   :  { %v207_v23 = vadd.f32 %v206_v21, %v143_v15  ;;  %v227_v24 = vadd.f32 %v226_v22, %v144_v16  ;;  %333 = vmatmul.f32.vlgmr.msrb.gmra.mxu1 %v187_v20 }
  0xb5   :  { %353 = vmatmul.f32.vlgmr.msrb.gmra.mxu2 %v207_v23  ;;  %373 = vmatmul.f32.vlgmr.msrb.gmra.mxu3 %v227_v24 }
 0x12f   :  { %v314_v31 = vpop.f32.mrf.mxu0 }
 0x130   :  { %v315_v32 = vadd.f32 %v444_v30, %v314_v31  ;;  %v334_v33 = vpop.f32.mrf.mxu1 }
 0x132   :  { %v335_v34 = vadd.f32 %v334_v33, %v315_v32 }
 0x138   :  { %v354_v35 = vpop.f32.mrf.mxu2  ;;  %v374_v36 = vpop.f32.mrf.mxu3 }
 0x139   :  { %v355_v37 = vadd.f32 %v354_v35, %v335_v34 }
 0x13b   :  { %v375_v38 = vadd.f32 %v374_v36, %v355_v37 }
 0x13d   :  { %413 = vmatmul.f32.vlgmr.msra.gmra.mxu0 %v375_v38 }
 0x1ba   :  { %v414_v40 = vpop.f32.mrf.mxu0 }
 0x1bb   :  { %v415_v41 = vadd.f32 %v445_v39, %v414_v40 }
 0x1bd   :  { %417 = vst [vmem:[#allocation8] sm:$0xff] %v415_v41 }
 0x1be   :  { %428 = dma.vmem_to_hbm [thread:$0]  %s424_s24, 128, %s426_s27, [#allocation4]  }
 0x1bf   :  { %546 = dma.done.wait [#allocation4], 128  }
 0x1c0   :  { %547 = vsyncadd [#allocation4], 4294967168 }
 0x1c1   :  { %433 = vsyncpa [#allocation3], 1 }
 0x1c2   :  { %434 = vsyncpa [#allocation6], 1 }
 0x1c3   :  { %435 = vsyncpa [#allocation4], 1 }

</bundles_post_ra>
